<compile_context>
chip_gen: v5e
topology: v5e:2x2
jax: 0.10.0
libtpu: 0.0.40
codegen_flags: <defaults>
</compile_context>

<pallas_src>
import functools

import jax
import jax.numpy as jnp
from jax import lax
from jax.experimental import pallas as pl
from jax.experimental.pallas import tpu as pltpu


# ----------------------------------------------------------------------------
# Kernel 1: farthest point sampling (one batch element per grid step)
# ----------------------------------------------------------------------------
def _fps_kernel(xyz_ref, idx_ref, cxyz_ref, *, npoint):
    """
    xyz_ref  : [1, 3, N]       coords on sublanes, points on lanes
    idx_ref  : [1, 1, npoint]  int32 sampled point indices
    cxyz_ref : [1, 3, npoint]  coords of the sampled points
    """
    x = xyz_ref[0]                                               # [3, N]
    n = x.shape[1]
    lane = lax.broadcasted_iota(jnp.int32, (1, n), 1)            # [1, N]
    out_lane = lax.broadcasted_iota(jnp.int32, (1, npoint), 1)   # [1, npoint]

    def body(i, carry):
        farthest, dist, idx_acc, cent_acc = carry                # (1,1)(1,N)(1,P)(3,P)
        idx_acc = jnp.where(out_lane == i, farthest, idx_acc)
        onehot = (lane == farthest).astype(jnp.float32)          # exact one-hot gather
        centroid = jnp.sum(x * onehot, axis=1, keepdims=True)    # [3, 1]
        cent_acc = jnp.where(out_lane == i, centroid, cent_acc)
        d = jnp.sum((x - centroid) ** 2, axis=0, keepdims=True)  # [1, N]
        dist = jnp.minimum(dist, d)
        m = jnp.max(dist, axis=1, keepdims=True)                 # [1, 1]
        # argmax with first-occurrence tie-break (matches torch.max semantics)
        farthest = jnp.min(jnp.where(dist == m, lane, n), axis=1, keepdims=True)
        return farthest, dist, idx_acc, cent_acc

    init = (jnp.zeros((1, 1), jnp.int32),                 # deterministic start idx 0
            jnp.full((1, n), 1e10, jnp.float32),
            jnp.zeros((1, npoint), jnp.int32),
            jnp.zeros((3, npoint), jnp.float32))
    _, _, idx_acc, cent_acc = lax.fori_loop(0, npoint, body, init)
    idx_ref[0] = idx_acc
    cxyz_ref[0] = cent_acc


def farthest_point_sample(xyz_t, npoint):
    """xyz_t: [B, 3, N] -> (idx [B, npoint] int32, new_xyz_t [B, 3, npoint])."""
    B, _, N = xyz_t.shape
    idx, cxyz = pl.pallas_call(
        functools.partial(_fps_kernel, npoint=npoint),
        out_shape=(jax.ShapeDtypeStruct((B, 1, npoint), jnp.int32),
                   jax.ShapeDtypeStruct((B, 3, npoint), jnp.float32)),
        grid=(B,),
        in_specs=[pl.BlockSpec((1, 3, N), lambda b: (b, 0, 0))],
        out_specs=[pl.BlockSpec((1, 1, npoint), lambda b: (b, 0, 0)),
                   pl.BlockSpec((1, 3, npoint), lambda b: (b, 0, 0))],
        compiler_params=pltpu.CompilerParams(dimension_semantics=("parallel",)),
    )(xyz_t)
    return idx[:, 0, :], cxyz


# ----------------------------------------------------------------------------
# Kernel 2: fused (concat-fold) MLP chain + group max-pool
# ----------------------------------------------------------------------------
def _group_mlp_pool_kernel(*refs, num_layers, has_points, ts, k, compute_dtype):
    """
    refs (inputs): grouped_xyz [ts*k, 3], (grouped_pts [ts*k, D]),
                   W_xyz [3, C0], (W_pts [D, C0]), shift0 [1, C0],
                   then (W_i [C_{i-1}, C_i], shift_i [1, C_i]) x (num_layers - 1)
    refs[-1]     : out [ts, C_last]
    """
    out_ref = refs[-1]
    refs = refs[:-1]
    pos = 0
    gx = refs[pos][...]; pos += 1                                  # [ts*k, 3]
    if has_points:
        gp = refs[pos][...]; pos += 1                              # [ts*k, D]
        wg, wp, s0 = refs[pos], refs[pos + 1], refs[pos + 2]; pos += 3
        # concat([xyz_norm, points]) @ W  ==  xyz_norm @ Wg + points @ Wp
        y = (jnp.dot(gx, wg[...], preferred_element_type=jnp.float32)
             + jnp.dot(gp, wp[...], preferred_element_type=jnp.float32))
    else:
        w0, s0 = refs[pos], refs[pos + 1]; pos += 2
        y = jnp.dot(gx, w0[...], preferred_element_type=jnp.float32)
    y = jnp.maximum(y + s0[...], 0.0)                              # BN shift + ReLU (f32)
    for _ in range(num_layers - 1):
        w, s = refs[pos], refs[pos + 1]; pos += 2
        y = jnp.maximum(
            jnp.dot(y.astype(compute_dtype), w[...],
                    preferred_element_type=jnp.float32) + s[...], 0.0)
    c_last = y.shape[-1]
    out_ref[...] = jnp.max(y.reshape(ts, k, c_last), axis=1)       # pool over nsample


def _choose_ts(n_groups, k, cin, mlp_dims, in_bytes, budget):
    """Largest centroid-tile (rows of groups) fitting a VMEM budget."""
    c_max = max(mlp_dims + [cin])
    c_last = mlp_dims[-1]

    def footprint(t):
        rows = t * k
        return (rows * cin * in_bytes * 2          # double-buffered group inputs
                + rows * c_max * 4 * 3             # f32 activations + cast headroom
                + t * c_last * 4 * 2)              # double-buffered output

    if footprint(n_groups) <= budget:
        return n_groups
    cands = [t for t in range(8, n_groups, 8) if n_groups % t == 0]
    for t in sorted(cands, reverse=True):
        if footprint(t) <= budget:
            return t
    return cands[0] if cands else n_groups


def group_mlp_pool(params, gxyz, gpts, *, eps=1e-5, use_bf16=True,
                   ts=None, vmem_budget=16 * 1024 * 1024):
    """gxyz: [B, S, K, 3], gpts: [B, S, K, D] or None -> [B, S, mlp[-1]] (f32)."""
    B, S, K, _ = gxyz.shape
    has_pts = gpts is not None
    D = gpts.shape[-1] if has_pts else 0
    mlp_dims = [int(lp["w"].shape[0]) for lp in params]
    c_last = mlp_dims[-1]
    cdt = jnp.bfloat16 if use_bf16 else jnp.float32

    # Fold BN (inference stats) into the conv weights; keep only shift in-kernel.
    fused = []
    for lp in params:
        scale = lp["gamma"] / jnp.sqrt(lp["var"] + eps)                # [Cout]
        w_f = (lp["w"] * scale[:, None]).T.astype(cdt)                 # [Cin, Cout]
        shift = ((lp["b"] - lp["mean"]) * scale + lp["beta"]).astype(jnp.float32)
        fused.append((w_f, shift[None, :]))

    BS = B * S
    if ts is None:
        ts = _choose_ts(BS, K, 3 + D, mlp_dims, 2 if use_bf16 else 4, vmem_budget)
    rows = ts * K

    # Flatten batch x centroid into the row dimension (many grid steps, full
    # (8,128)-aligned M tiles, both TensorCores get work).
    gxyz_f = gxyz.reshape(BS * K, 3).astype(cdt)
    operands = [gxyz_f]
    in_specs = [pl.BlockSpec((rows, 3), lambda i: (i, 0))]
    if has_pts:
        operands.append(gpts.reshape(BS * K, D).astype(cdt))
        in_specs.append(pl.BlockSpec((rows, D), lambda i: (i, 0)))

    w0, s0 = fused[0]
    if has_pts:
        wg, wp = w0[:3], w0[3:]
        operands += [wg, wp, s0]
        in_specs += [pl.BlockSpec(wg.shape, lambda i: (0, 0)),
                     pl.BlockSpec(wp.shape, lambda i: (0, 0)),
                     pl.BlockSpec(s0.shape, lambda i: (0, 0))]
    else:
        operands += [w0, s0]
        in_specs += [pl.BlockSpec(w0.shape, lambda i: (0, 0)),
                     pl.BlockSpec(s0.shape, lambda i: (0, 0))]
    for w_f, sh in fused[1:]:
        operands += [w_f, sh]
        in_specs += [pl.BlockSpec(w_f.shape, lambda i: (0, 0)),
                     pl.BlockSpec(sh.shape, lambda i: (0, 0))]

    kernel = functools.partial(_group_mlp_pool_kernel,
                               num_layers=len(params), has_points=has_pts,
                               ts=ts, k=K, compute_dtype=cdt)
    out = pl.pallas_call(
        kernel,
        out_shape=jax.ShapeDtypeStruct((BS, c_last), jnp.float32),
        grid=(BS // ts,),
        in_specs=in_specs,
        out_specs=pl.BlockSpec((ts, c_last), lambda i: (i, 0)),
        compiler_params=pltpu.CompilerParams(
            dimension_semantics=("parallel",),
            vmem_limit_bytes=48 * 1024 * 1024),
    )(*operands)
    return out.reshape(B, S, c_last)


# ----------------------------------------------------------------------------
# XLA glue: grouping (data-dependent gather, mirrors the torch helpers)
# ----------------------------------------------------------------------------
def _square_distance(src, dst):
    return jnp.sum((src[:, :, None, :] - dst[:, None, :, :]) ** 2, axis=-1)


def _index_points(points, idx):
    b = jnp.arange(points.shape[0])[:, None, None]
    return points[b, idx]                                  # [B, S, K, C]


def _ball_query(radius, nsample, xyz, new_xyz):
    B, N, _ = xyz.shape
    S = new_xyz.shape[1]
    sqr = _square_distance(new_xyz, xyz)                   # [B, S, N]
    gidx = jnp.broadcast_to(jnp.arange(N, dtype=jnp.int32)[None, None, :], (B, S, N))
    gidx = jnp.where(sqr > radius ** 2, N, gidx)
    gidx = jnp.sort(gidx, axis=-1)[:, :, :nsample]
    first = gidx[:, :, :1]
    gidx = jnp.where(gidx == N, first, gidx)
    return jnp.clip(gidx, 0, N - 1).astype(jnp.int32)


# ----------------------------------------------------------------------------
# Full forward
# ----------------------------------------------------------------------------
def pointnet_sa_forward(params, xyz, points, *, npoint=None, radius=None,
                        nsample=None, group_all=False, knn=False,
                        eps=1e-5, use_bf16=True):
    """xyz: [B, N, 3], points: [B, N, D] or None -> (new_xyz [B,S,3], feats [B,S,mlp[-1]])."""
    B, N, _ = xyz.shape
    if group_all:
        new_xyz = jnp.zeros((B, 1, 3), jnp.float32)
        gxyz = xyz[:, None, :, :]                          # no centering (matches torch)
        gpts = points[:, None, :, :] if points is not None else None
    else:
        xyz_t = jnp.transpose(xyz, (0, 2, 1))              # [B, 3, N] for the FPS kernel
        _, new_xyz_t = farthest_point_sample(xyz_t, npoint)
        new_xyz = jnp.transpose(new_xyz_t, (0, 2, 1))      # [B, npoint, 3]
        if knn:
            d = _square_distance(new_xyz, xyz)
            idx = jnp.argsort(d, axis=-1)[:, :, :nsample].astype(jnp.int32)
        else:
            idx = _ball_query(radius, nsample, xyz, new_xyz)
        gxyz = _index_points(xyz, idx) - new_xyz[:, :, None, :]
        gpts = _index_points(points, idx) if points is not None else None
    feats = group_mlp_pool(params, gxyz, gpts, eps=eps, use_bf16=use_bf16)
    return new_xyz, feats


# ----------------------------------------------------------------------------
# Parameters (mirrors nn.Conv2d(k=1) + nn.BatchNorm2d shapes, inference stats)
# ----------------------------------------------------------------------------
def init_params(key, in_channel, mlp):
    params = []
    last = in_channel
    for out_c in mlp:
        key, k1, k2, k3, k4, k5, k6 = jax.random.split(key, 7)
        bound = 1.0 / (last ** 0.5)
        params.append(dict(
            w=jax.random.uniform(k1, (out_c, last), jnp.float32, -bound, bound),
            b=jax.random.uniform(k2, (out_c,), jnp.float32, -bound, bound),
            gamma=jax.random.uniform(k3, (out_c,), jnp.float32, 0.5, 1.5),
            beta=0.1 * jax.random.normal(k4, (out_c,), jnp.float32),
            mean=0.1 * jax.random.normal(k5, (out_c,), jnp.float32),
            var=jax.random.uniform(k6, (out_c,), jnp.float32, 0.5, 1.5),
        ))
        last = out_c
    return params


# ----------------------------------------------------------------------------
# Pure-JAX reference (independent FPS; same bf16 operand policy as the kernel)
# ----------------------------------------------------------------------------
def _fps_reference(xyz, npoint):
    B, N, _ = xyz.shape

    def body(i, carry):
        centroids, distance, farthest = carry
        centroids = centroids.at[:, i].set(farthest)
        centroid = xyz[jnp.arange(B), farthest][:, None, :]
        dist = jnp.sum((xyz - centroid) ** 2, axis=-1)
        distance = jnp.minimum(distance, dist)
        farthest = jnp.argmax(distance, axis=-1).astype(jnp.int32)
        return centroids, distance, farthest

    init = (jnp.zeros((B, npoint), jnp.int32),
            jnp.full((B, N), 1e10, jnp.float32),
            jnp.zeros((B,), jnp.int32))
    centroids, _, _ = lax.fori_loop(0, npoint, body, init)
    return centroids


def reference_forward(params, xyz, points, npoint, radius, nsample,
                      group_all, knn=False, eps=1e-5, use_bf16=True):
    B, N, _ = xyz.shape
    if group_all:
        new_xyz = jnp.zeros((B, 1, 3), jnp.float32)
        gxyz = xyz[:, None, :, :]
        gpts = points[:, None, :, :] if points is not None else None
    else:
        fps_idx = _fps_reference(xyz, npoint)
        new_xyz = xyz[jnp.arange(B)[:, None], fps_idx]
        if knn:
            d = _square_distance(new_xyz, xyz)
            idx = jnp.argsort(d, axis=-1)[:, :, :nsample].astype(jnp.int32)
        else:
            idx = _ball_query(radius, nsample, xyz, new_xyz)
        gxyz = _index_points(xyz, idx) - new_xyz[:, :, None, :]
        gpts = _index_points(points, idx) if points is not None else None
    x = jnp.concatenate([gxyz, gpts], axis=-1) if gpts is not None else gxyz
    cdt = jnp.bfloat16 if use_bf16 else jnp.float32
    for lp in params:
        scale = lp["gamma"] / jnp.sqrt(lp["var"] + eps)
        w_f = (lp["w"] * scale[:, None]).T.astype(cdt).astype(jnp.float32)
        shift = (lp["b"] - lp["mean"]) * scale + lp["beta"]
        y = jnp.einsum("bskc,co->bsko", x.astype(cdt).astype(jnp.float32), w_f,
                       precision=lax.Precision.HIGHEST) + shift
        x = jnp.maximum(y, 0.0)
    return new_xyz, jnp.max(x, axis=2)


if __name__ == "__main__":
    key = jax.random.PRNGKey(0)
    B, N, D = 2, 128, 16
    npoint, radius, nsample = 32, 1.0, 16
    mlp = [64, 128]
    in_channel = D + 3

    k1, k2, kp = jax.random.split(key, 3)
    xyz = jax.random.normal(k1, (B, N, 3), jnp.float32)
    points = jax.random.normal(k2, (B, N, D), jnp.float32)
    params = init_params(kp, in_channel, mlp)

    # --- sample_and_group path (FPS + ball query) ---
    new_xyz, new_feat = pointnet_sa_forward(
        params, xyz, points, npoint=npoint, radius=radius, nsample=nsample,
        group_all=False, knn=False)
    jax.block_until_ready((new_xyz, new_feat))

    ref_xyz, ref_feat = reference_forward(
        params, xyz, points, npoint, radius, nsample, group_all=False, knn=False)
    assert new_xyz.shape == (B, npoint, 3), new_xyz.shape
    assert new_feat.shape == (B, npoint, mlp[-1]), new_feat.shape
    assert jnp.allclose(new_xyz, ref_xyz, atol=1e-5), \
        float(jnp.max(jnp.abs(new_xyz - ref_xyz)))
    assert jnp.allclose(new_feat, ref_feat, rtol=1e-2, atol=1e-2), \
        float(jnp.max(jnp.abs(new_feat - ref_feat)))

    # --- group_all path ---
    ga_xyz, ga_feat = pointnet_sa_forward(params, xyz, points, group_all=True)
    jax.block_until_ready((ga_xyz, ga_feat))
    ref_ga_xyz, ref_ga_feat = reference_forward(
        params, xyz, points, None, None, None, group_all=True)
    assert ga_feat.shape == (B, 1, mlp[-1]), ga_feat.shape
    assert jnp.allclose(ga_xyz, ref_ga_xyz, atol=1e-6)
    assert jnp.allclose(ga_feat, ref_ga_feat, rtol=1e-2, atol=1e-2), \
        float(jnp.max(jnp.abs(ga_feat - ref_ga_feat)))

    print("KERNEL_OK")
</pallas_src>

<mosaic_0001>
module attributes {stable_mosaic.version = 11 : i64} {
  func.func @_fps_kernel(%arg0: i32, %arg1: memref<1x3x128xf32, #tpu.memory_space<vmem>>, %arg2: memref<1x1x32xi32, #tpu.memory_space<vmem>>, %arg3: memref<1x3x32xf32, #tpu.memory_space<vmem>>) attributes {dimension_semantics = [#tpu.dimension_semantics<parallel>], iteration_bounds = array<i64: 2>, scalar_prefetch = 0 : i64, scratch_operands = 0 : i64, tpu.core_type = #tpu.core_type<tc>, window_params = [{transform_indices = @transform_0, window_bounds = array<i64: 1, 3, 128>}, {transform_indices = @transform_1, window_bounds = array<i64: 1, 1, 32>}, {transform_indices = @transform_2, window_bounds = array<i64: 1, 3, 32>}]} {
    %c0 = arith.constant 0 : index
    %c0_0 = arith.constant 0 : index
    %c0_1 = arith.constant 0 : index
    %0 = vector.load %arg1[%c0, %c0_0, %c0_1] : memref<1x3x128xf32, #tpu.memory_space<vmem>>, vector<1x3x128xf32>
    %1 = vector.shape_cast %0 : vector<1x3x128xf32> to vector<3x128xf32>
    %2 = tpu.iota {dimensions = array<i32: 1>} : vector<1x128xi32>
    %3 = tpu.iota {dimensions = array<i32: 1>} : vector<1x32xi32>
    %c0_i32 = arith.constant 0 : i32
    %4 = vector.broadcast %c0_i32 : i32 to vector<1x1xi32>
    %cst = arith.constant 1.000000e+10 : f32
    %5 = vector.broadcast %cst : f32 to vector<1x128xf32>
    %c0_i32_2 = arith.constant 0 : i32
    %6 = vector.broadcast %c0_i32_2 : i32 to vector<1x32xi32>
    %cst_3 = arith.constant 0.000000e+00 : f32
    %7 = vector.broadcast %cst_3 : f32 to vector<3x32xf32>
    %c0_i32_4 = arith.constant 0 : i32
    %c32_i32 = arith.constant 32 : i32
    %8 = arith.addi %c0_i32_4, %c32_i32 : i32
    %c1_i32 = arith.constant 1 : i32
    %9:4 = scf.for %arg4 = %c0_i32_4 to %8 step %c1_i32 iter_args(%arg5 = %4, %arg6 = %5, %arg7 = %6, %arg8 = %7) -> (vector<1x1xi32>, vector<1x128xf32>, vector<1x32xi32>, vector<3x32xf32>)  : i32 {
      %16 = vector.broadcast %arg4 : i32 to vector<1x32xi32>
      %17 = arith.cmpi eq, %3, %16 : vector<1x32xi32>
      %18 = vector.shape_cast %arg5 : vector<1x1xi32> to vector<1x1xi32>
      %19 = vector.broadcast %18 : vector<1x1xi32> to vector<1x32xi32>
      %20 = arith.select %17, %19, %arg7 : vector<1x32xi1>, vector<1x32xi32>
      %21 = vector.broadcast %arg5 : vector<1x1xi32> to vector<1x128xi32>
      %22 = arith.cmpi eq, %2, %21 : vector<1x128xi32>
      %23 = arith.extui %22 : vector<1x128xi1> to vector<1x128xi32>
      %24 = arith.sitofp %23 : vector<1x128xi32> to vector<1x128xf32>
      %25 = vector.broadcast %24 : vector<1x128xf32> to vector<3x128xf32>
      %26 = arith.mulf %1, %25 : vector<3x128xf32>
      %cst_12 = arith.constant dense<0.000000e+00> : vector<3xf32>
      %27 = vector.multi_reduction <add>, %26, %cst_12 [1] : vector<3x128xf32> to vector<3xf32>
      %28 = vector.shape_cast %27 : vector<3xf32> to vector<3x1xf32>
      %29 = vector.broadcast %arg4 : i32 to vector<1x32xi32>
      %30 = arith.cmpi eq, %3, %29 : vector<1x32xi32>
      %31 = vector.shape_cast %30 : vector<1x32xi1> to vector<1x32xi1>
      %32 = vector.broadcast %31 : vector<1x32xi1> to vector<3x32xi1>
      %33 = vector.shape_cast %28 : vector<3x1xf32> to vector<3x1xf32>
      %34 = vector.broadcast %33 : vector<3x1xf32> to vector<3x32xf32>
      %35 = arith.select %32, %34, %arg8 : vector<3x32xi1>, vector<3x32xf32>
      %36 = vector.broadcast %28 : vector<3x1xf32> to vector<3x128xf32>
      %37 = arith.subf %1, %36 : vector<3x128xf32>
      %38 = arith.mulf %37, %37 : vector<3x128xf32>
      %cst_13 = arith.constant dense<0.000000e+00> : vector<128xf32>
      %39 = vector.multi_reduction <add>, %38, %cst_13 [0] : vector<3x128xf32> to vector<128xf32>
      %40 = vector.shape_cast %39 : vector<128xf32> to vector<1x128xf32>
      %41 = arith.minimumf %arg6, %40 : vector<1x128xf32>
      %cst_14 = arith.constant dense<0xFF800000> : vector<1xf32>
      %42 = vector.multi_reduction <maximumf>, %41, %cst_14 [1] : vector<1x128xf32> to vector<1xf32>
      %43 = vector.shape_cast %42 : vector<1xf32> to vector<1x1xf32>
      %44 = vector.broadcast %43 : vector<1x1xf32> to vector<1x128xf32>
      %45 = arith.cmpf oeq, %41, %44 : vector<1x128xf32>
      %c128_i32 = arith.constant 128 : i32
      %46 = vector.broadcast %c128_i32 : i32 to vector<1x128xi32>
      %47 = arith.select %45, %2, %46 : vector<1x128xi1>, vector<1x128xi32>
      %cst_15 = arith.constant dense<2147483647> : vector<1xi32>
      %48 = vector.multi_reduction <minsi>, %47, %cst_15 [1] : vector<1x128xi32> to vector<1xi32>
      %49 = vector.shape_cast %48 : vector<1xi32> to vector<1x1xi32>
      scf.yield %49, %41, %20, %35 : vector<1x1xi32>, vector<1x128xf32>, vector<1x32xi32>, vector<3x32xf32>
    }
    %c32_i32_5 = arith.constant 32 : i32
    %c0_6 = arith.constant 0 : index
    %c0_7 = arith.constant 0 : index
    %c0_8 = arith.constant 0 : index
    %10 = vector.load %arg2[%c0_6, %c0_7, %c0_8] : memref<1x1x32xi32, #tpu.memory_space<vmem>>, vector<1x1x32xi32>
    %11 = vector.shape_cast %10 : vector<1x1x32xi32> to vector<1x32xi32>
    %12 = vector.shape_cast %9#2 : vector<1x32xi32> to vector<1x1x32xi32>
    tpu.vector_store %arg2[%c0_6, %c0_7, %c0_8], %12 {strides = array<i32>} : memref<1x1x32xi32, #tpu.memory_space<vmem>>, vector<1x1x32xi32>,
    %c0_9 = arith.constant 0 : index
    %c0_10 = arith.constant 0 : index
    %c0_11 = arith.constant 0 : index
    %13 = vector.load %arg3[%c0_9, %c0_10, %c0_11] : memref<1x3x32xf32, #tpu.memory_space<vmem>>, vector<1x3x32xf32>
    %14 = vector.shape_cast %13 : vector<1x3x32xf32> to vector<3x32xf32>
    %15 = vector.shape_cast %9#3 : vector<3x32xf32> to vector<1x3x32xf32>
    tpu.vector_store %arg3[%c0_9, %c0_10, %c0_11], %15 {strides = array<i32>} : memref<1x3x32xf32, #tpu.memory_space<vmem>>, vector<1x3x32xf32>,
    return
  }
  func.func @transform_0(%arg0: i32) -> (i32, i32, i32) {
    %c0_i32 = arith.constant 0 : i32
    %c0_i32_0 = arith.constant 0 : i32
    %c0_i32_1 = arith.constant 0 : i32
    return %arg0, %c0_i32, %c0_i32_0 : i32, i32, i32
  }
  func.func @transform_1(%arg0: i32) -> (i32, i32, i32) {
    %c0_i32 = arith.constant 0 : i32
    %c0_i32_0 = arith.constant 0 : i32
    %c0_i32_1 = arith.constant 0 : i32
    return %arg0, %c0_i32, %c0_i32_0 : i32, i32, i32
  }
  func.func @transform_2(%arg0: i32) -> (i32, i32, i32) {
    %c0_i32 = arith.constant 0 : i32
    %c0_i32_0 = arith.constant 0 : i32
    %c0_i32_1 = arith.constant 0 : i32
    return %arg0, %c0_i32, %c0_i32_0 : i32, i32, i32
  }
}

</mosaic_0001>

<bundles_post_ra>
// kernel: tpu_custom_call.1
= control target key start
LH: loop header
LB: loop body
LE: loop exit
PB: predicated region body
PF: predicated region fallthrough
CT: control target
= control target key end

     0   :  { %8 = vsyncpa [#allocation3], 0  ;;  %s646_s0 = inlined_call_operand.vmem [shape: f32[2,3,128], index: 0, kind: input, shape index: {}]   ;;  %s647_s1 = inlined_call_operand.hbm [shape: s32[2,1,32], index: 1, kind: output, shape index: {0}]   ;;  %s648_s2 = inlined_call_operand.vmem [shape: f32[2,3,32], index: 2, kind: output, shape index: {1}]  }
   0x1   :  { %10 = vsyncpa [#allocation3 + $0x1], 0  ;;  %s533_s9 = smov 0   ;;  %s535_s10 = smov 0  }
   0x2   :  { %s537_s11 = smov 0   ;;  %s539_s12 = smov 0  }
   0x3 LB: > { %s554_s13 = sadd.s32 4294967295, %s495_s12   ;;  %s324_s14 = sadd.s32 4294967294, %s495_s12   ;;  %s495_s12 = sphi %s539_s12, %s654_s12   ;;  %s491_s11 = sphi %s537_s11, %s653_s11   ;;  %s487_s10 = sphi %s535_s10, %s652_s10   ;;  %s483_s9 = sphi %s533_s9, %s651_s9  }
   0x4   : > { %s558_s15 = sadd.s32 1, %s495_s12   ;;  %s49_s16 = sadd.s32 1, %s491_s11 }
   0x5   : > { %s46_s17 = ssub.s32 %s495_s12, %s558_s15  ;;  %p59_p0 = scmp.ne.s32.totalorder %s491_s11, %s487_s10 }
   0x6   : > { %p47_p1 = scmp.eq.s32.totalorder %s46_s17, 0  ;;  %p60_p2 = scmp.eq.s32.totalorder %s554_s13, 1 }
   0x7   : > { %p65_p3 = scmp.ne.s32.totalorder %s487_s10, %s483_s9  ;;  %p66_p4 = scmp.eq.s32.totalorder %s324_s14, 1 }
   0x8   : > { %s569_s18 = scalar_select %p47_p1, %s491_s11, %s49_s16  }
   0x9   : > { %p571_p5 = por %p60_p2, %p59_p0  ;;  %p575_p6 = por %p66_p4, %p65_p3 }
   0xa   : > { %p327_p7 = scmp.ge.s32.totalorder %s495_s12, 1  ;;  %p117_p8 = scmp.lt.s32.totalorder %s495_s12, 3 }
   0xc   : > { %p118_p9 = pnand %p327_p7, %p117_p8 }
   0xd   : > { %s133_s21 = sand.u32 (!%p118_p9), 1, %s487_s10   ;;  %p141_p10 = scmp.lt.s32.totalorder (!%p118_p9), %s554_s13, 1 }
   0xe   : > { %121 = sbr.rel (%p118_p9) target bundleno = 525 (0x20d), region = 24  ;;  %s596_s30 = scalar_lea.vmem (!%p118_p9), [#allocation2], %s133_s21 }
   0xf   : > { %s598_s3 = smov (!%p118_p9), 0  }
  0x13   : > { %v150_v0 = vlaneseq  ;;  %s142_s22 = scalar_select %p141_p10, %s554_s13, 1  ;;  %v497_v3 = vmov 0.0   ;;  %v501_v4 = vmov 0   ;;  %v505_v5 = vmov 1e+10  }
  0x14   : > { %v509_v6 = vmov 0  }
  0x15   : > { %v584_v1 = vand.u32 127, %v150_v0  ;;  %s328_s23 = sshll.u32 %s142_s22, 2 }
  0x16   : > { %s144_s26 = scalar_lea.vmem %s646_s0, %s328_s23  ;;  %s592_s29 = scalar_lea.vmem %s648_s2, %s328_s23 }
  0x17   : > { %v149_v2 = vld [vmem:[%s144_s26] sm:$0x7] }
  0x18 LB: >> { %vm165_vm0 = vcmp.eq.s32.totalorder %v584_v1, %v511_v6  ;;  %v517_v7 = vmov 0.0   ;;  %vm169_vm1 = vcmask 1042432   ;;  %v162_v11 = vstv %s515_s3  ;;  %s157_s3 = sadd.s32 1, %s515_s3   ;;  %s515_s3 = sphi %s598_s3, %s157_s3   ;;  %v511_v6 = vphi %v509_v6, %v203_v6   ;;  %v507_v5 = vphi %v505_v5, %v185_v5   ;;  %v503_v4 = vphi %v501_v4, %v502_v4   ;;  %v499_v3 = vphi %v497_v3, %v498_v3  }
  0x19   : >> { %v330_v8 = vsel %vm165_vm0, 1.0, %v517_v7  ;;  %vm163_vm2 = vcmp.eq.s32.totalorder %v584_v1, %v162_v11  ;;  %p154_p11 = scmp.ge.s32.totalorder %s157_s3, 32  }
  0x1a   : >> { %v168_v9 = vmul.f32 %v330_v8, %v149_v2  ;;  %v164_v12 = vsel %vm163_vm2, %v511_v6, %v503_v4   ;;  %vm204_vm5 = vcmask (%p154_p11), 253952   ;;  %vm206_vm6 = vcmask (%p154_p11), 256000   ;;  %s221_s6 = scalar_lea.hbm (%p154_p11), %s647_s1, %s554_s13  ;;  %s223_s7 = sshll.u32 (%p154_p11), %s596_s30, 4  ;;  %s224_s7 = int_to_ptr.vmem [resolvable:$true] %s223_s7 }
  0x1b   : >> { %v502_v4 = vmov %v164_v12   ;;  %205 = vst.msk [vmem:[%s596_s30] sm:$0x1] (%p154_p11), %vm204_vm5, %v164_v12  ;;  %s225_s8 = sshll.u32 (%p154_p11), %s221_s6, 4  ;;  %s209_s14 = scalar_lea.sflag (%p154_p11), [#allocation3], %s133_s21  ;;  %s226_s8 = int_to_ptr.hbm [resolvable:$true] %s225_s8 }
  0x1c   : >> { %v170_v10 = vsel %vm169_vm1, %v168_v9, 0.0  ;;  %s427_s16 = sshra.s32 (%p154_p11), %s226_s8, 4  ;;  %s433_s24 = scalar_lea.hbm (%p154_p11), %s647_s1, 2  ;;  %s428_s16 = int_to_ptr.hbm [resolvable:$true] %s427_s16 }
  0x1d   : >> { %171 = vadd.xlane.f32.xlu0 %v170_v10  ;;  %s429_s17 = scalar_lea.hbm (%p154_p11), %s428_s16, 1  ;;  %p434_p1 = scmp.lt.s32.totalorder (%p154_p11), %s428_s16, %s647_s1 }
  0x1e   : > { %p430_p12 = scmp.ne.s32.totalorder (%p154_p11), %s428_s16, %s429_s17  ;;  %p435_p2 = scmp.lt.s32.totalorder (%p154_p11), %s433_s24, %s429_s17 }
  0x20   : > { %p431_p13 = pnand (%p154_p11), %p430_p12, %p571_p5  ;;  %p436_p3 = por (%p154_p11), %p435_p2, %p434_p1 }
  0x22   : > { %p432_p0 = pneg (%p154_p11), %p431_p13 }
  0x24   : > { %p437_p4 = pnand (%p154_p11), %p436_p3, %p432_p0 }
  0x90   : >> { %v172_v13 = vpop.xlane.xlu0 %171 }
  0x91   : >> { %v175_v14 = vsel %vm163_vm2, %v172_v13, %v499_v3   ;;  %v176_v15 = vsub.f32 %v149_v2, %v172_v13 }
  0x92   : >> { %v498_v3 = vmov %v175_v14   ;;  %207 = vst.msk [vmem:[%s592_s29] sm:$0x7] (%p154_p11), %vm206_vm6, %v175_v14 }
  0x93   : >> { %v177_v16 = vmul.f32 %v176_v15, %v176_v15 }
  0x95   : >> { %v178_v17 = vsel %vm169_vm1, %v177_v16, 0.0 }
  0x96   : >> { %v179_v18 = vrot.slane %v178_v17, 4 }
  0x98   : >> { %v180_v19 = vadd.f32 %v179_v18, %v178_v17 }
  0x9a   : >> { %v181_v20 = vrot.slane %v180_v19, 2 }
  0x9c   : >> { %v182_v21 = vadd.f32 %v181_v20, %v180_v19 }
  0x9e   : >> { %v183_v22 = vrot.slane %v182_v21, 1 }
  0xa0   : >> { %v184_v23 = vadd.f32 %v183_v22, %v182_v21 }
  0xa2   : >> { %v185_v5 = vmin.f32 %v507_v5, %v184_v23  }
  0xa4   : >> { %186 = vmax.xlane.f32.xlu0 %v185_v5 }
 0x117   : >> { %v187_v24 = vpop.xlane.xlu0 %186 }
 0x118   : >> { %vm188_vm3 = vcmp.eq.f32.partialorder %v185_v5, %v187_v24 }
 0x119   : >> { %v189_v25 = vsel %vm188_vm3, %v584_v1, 128 }
 0x11a   : >> { %v191_v26 = vshra.s32 %v189_v25, 16  ;;  %v190_v28 = vand.u32 65535, %v189_v25 }
 0x11c   : >> { %v193_v27 = vcvt.s32.f32 %v191_v26  ;;  %v192_v29 = vcvt.s32.f32 %v190_v28 }
 0x11e   : >> { %194 = vmin.xlane.f32.xlu1 %v193_v27 }
 0x191   : >> { %v195_v30 = vpop.xlane.xlu1 %194 }
 0x192   : >> { %vm196_vm4 = vcmp.eq.f32.partialorder %v193_v27, %v195_v30  ;;  %v201_v32 = vcvt.f32.s32 %v195_v30 }
 0x193   : >> { %v197_v31 = vsel %vm196_vm4, %v192_v29, inf }
 0x194   : >> { %198 = vmin.xlane.f32.xlu1 %v197_v31  ;;  %v202_v34 = vshll.u32 %v201_v32, 16 }
 0x206   : > { %156 = sbr.rel (!%p154_p11) target bundleno = 24 (0x18), region = 78 }
 0x207   : >> { %v199_v33 = vpop.xlane.xlu1 %198 }
 0x208   : >> { %v200_v35 = vcvt.f32.s32 %v199_v33 }
 0x20a   : >> { %v203_v6 = vadd.s32 %v202_v34, %v200_v35  }
 0x20b   : > { %440 = shalt.err (!%p437_p4)
}
 0x20c   : > { %333 = dma.vmem_to_hbm [thread:$0]  (%p571_p5), %s224_s7, 16, %s226_s8, %s209_s14  }
 0x20d PF: > { %p339_p7 = scmp.ge.s32.totalorder %s495_s12, 2  ;;  %s240_s21 = sand.u32 1, %s483_s9  }
 0x20e   : > { %s241_s26 = scalar_lea.sflag [#allocation3], %s240_s21 }
 0x20f   : > { %p336_p8 = pnand %p339_p7, %p575_p6 }
 0x211   : > { %p337_p9 = pneg %p336_p8 }
 0x213   : > { %478 = dma.done.wait (%p337_p9), %s241_s26, 16  }
 0x214   : > { %480 = vsyncadd (%p337_p9), %s241_s26, 4294967280  ;;  %p13_p10 = scmp.ge.s32.totalorder %s558_s15, 4   ;;  %s651_s9 = smov %s487_s10 }
 0x215   : > { %s652_s10 = smov %s491_s11  ;;  %s653_s11 = smov %s569_s18 }
 0x216   : > { %s654_s12 = smov %s558_s15  ;;  %15 = sbr.rel (!%p13_p10) target bundleno = 3 (0x3), region = 89 }
 0x21b   :  { %253 = vsyncpa [#allocation3], 1 }
 0x21c   :  { %255 = vsyncpa [#allocation3 + $0x1], 1 }

</bundles_post_ra>
